<compile_context>
chip_gen: v6e
topology: v6e:2x2x1
jax: 0.10.0
libtpu: 0.0.40
codegen_flags: <defaults>
</compile_context>

<pallas_src>
import functools

import jax
import jax.numpy as jnp
from jax.experimental import pallas as pl
from jax.experimental.pallas import tpu as pltpu


# ---------------------------------------------------------------------------
# Fused kernel.  Grid = (image, row_tile).  The pooled accumulator lives in a
# VMEM scratch; the heads / magnet epilogue runs only on the last row tile of
# each image and writes that image's output row.
# ---------------------------------------------------------------------------
def _fused_kernel(ncls, inv_p, magnet,
                  patches_ref, wconv_ref, bconv_ref, whead_ref, bhead_ref,
                  *rest):
    if magnet:
        centers_t_ref, c2_ref, onehot_ref, scale_ref, out_ref, acc_ref = rest
    else:
        out_ref, acc_ref = rest

    t = pl.program_id(1)

    @pl.when(t == 0)
    def _init():
        acc_ref[...] = jnp.zeros_like(acc_ref)

    # conv as an MXU matmul (bf16 inputs, f32 accumulate) + bias + ReLU.
    y = jnp.dot(patches_ref[0], wconv_ref[...],
                preferred_element_type=jnp.float32)              # [TILE_R, F]
    y = jnp.maximum(y + bconv_ref[...], 0.0)
    # partial global-average-pool: accumulate this tile's per-column sum.
    acc_ref[...] += jnp.sum(y, axis=0, keepdims=True)            # [1, F]

    @pl.when(t == pl.num_programs(1) - 1)
    def _finalize():
        pooled = acc_ref[...] * inv_p                            # [1, F]
        heads = jnp.dot(pooled, whead_ref[...],
                        preferred_element_type=jnp.float32) + bhead_ref[...]
        if magnet:
            emb = heads[:, ncls:]                                # [1, D]
            e2 = jnp.sum(emb * emb, axis=1, keepdims=True)       # [1, 1]
            cross = jnp.dot(emb, centers_t_ref[...],
                            preferred_element_type=jnp.float32)  # [1, J]
            d2 = jnp.maximum(e2 + c2_ref[...] - 2.0 * cross, 0.0)
            scores = jnp.exp(scale_ref[0] * d2)                  # scale = -1/(2*var)
            out_ref[0] = jnp.dot(scores, onehot_ref[...],
                                 preferred_element_type=jnp.float32)  # [1, ncls]
        else:
            out_ref[0] = heads[:, :ncls]


def _auto_tile_rows(p):
    for cand in (1024, 512, 256, 128, 64, 32, 16, 8):
        if p % cand == 0:
            return cand
    return p


def model_for_robustbench_forward(x_nchw, params, magnet_data=None, tile_rows=None):
    """Mirror of model_for_robustbench.forward (one fused Pallas kernel)."""
    N, C, H, W = x_nchw.shape
    F = params["conv_w"].shape[0]
    ncls = params["w_logits"].shape[1]
    CK = C * 9
    CKP = -(-CK // 64) * 64        # pad the MXU K dim / lane layout
    P = H * W

    # ---- host-side glue ----------------------------------------------------
    # TODO(synk): fold the conv into the kernel as 9 shifted [rows,C]x[C,F]
    # matmuls on an NHWC tile to avoid materializing the 9x-duplicated im2col
    # activations in HBM.
    patches = jax.lax.conv_general_dilated_patches(
        x_nchw, filter_shape=(3, 3), window_strides=(1, 1), padding="SAME")
    patches = jnp.transpose(patches, (0, 2, 3, 1)).reshape(N, P, CK)
    patches = jnp.pad(patches, ((0, 0), (0, 0), (0, CKP - CK))).astype(jnp.bfloat16)

    w_conv = params["conv_w"].reshape(F, CK).T                    # [CK, F]
    w_conv = jnp.pad(w_conv, ((0, CKP - CK), (0, 0))).astype(jnp.bfloat16)
    b_conv = params["conv_b"].reshape(1, F).astype(jnp.float32)

    # both heads fused into one matmul: [F, ncls + D]
    w_head = jnp.concatenate(
        [params["w_logits"], params["w_emb"]], axis=1).astype(jnp.float32)
    b_head = jnp.concatenate(
        [params["b_logits"].reshape(1, -1), params["b_emb"].reshape(1, -1)],
        axis=1).astype(jnp.float32)

    if tile_rows is None:
        tile_rows = _auto_tile_rows(P)
    assert P % tile_rows == 0, "row tile must divide H*W"
    n_tiles = P // tile_rows
    inv_p = 1.0 / float(P)

    grid = (N, n_tiles)
    patches_spec = pl.BlockSpec((1, tile_rows, CKP), lambda n, t: (n, t, 0))

    def _resident(arr):  # whole array resident in VMEM, same block every step
        nd = arr.ndim
        return pl.BlockSpec(arr.shape, lambda n, t, _nd=nd: (0,) * _nd)

    out_spec = pl.BlockSpec((1, 1, ncls), lambda n, t: (n, 0, 0))
    out_shape = jax.ShapeDtypeStruct((N, 1, ncls), jnp.float32)
    scratch_shapes = [pltpu.VMEM((1, F), jnp.float32)]
    compiler_params = pltpu.CompilerParams(
        dimension_semantics=("parallel", "arbitrary"),
        vmem_limit_bytes=32 * 1024 * 1024)

    if magnet_data is None:
        kernel = functools.partial(_fused_kernel, ncls, inv_p, False)
        out = pl.pallas_call(
            kernel,
            grid=grid,
            in_specs=[patches_spec, _resident(w_conv), _resident(b_conv),
                      _resident(w_head), _resident(b_head)],
            out_specs=out_spec,
            out_shape=out_shape,
            scratch_shapes=scratch_shapes,
            compiler_params=compiler_params,
        )(patches, w_conv, b_conv, w_head, b_head)
        return out.reshape(N, ncls)

    # ---- magnet-loss classification path ------------------------------------
    assert ncls == int(magnet_data["L"])
    centers = magnet_data["cluster_centers"].astype(jnp.float32)         # [J, D]
    centers_t = centers.T                                                # [D, J]
    c2 = jnp.sum(centers * centers, axis=1, keepdims=True).T             # [1, J]
    onehot = jax.nn.one_hot(magnet_data["cluster_classes"], ncls,
                            dtype=jnp.float32)                           # [J, ncls]
    # magnet_data["variance"] holds sigma^2 -> Gaussian scale = -1/(2*variance)
    variance = jnp.asarray(magnet_data["variance"], dtype=jnp.float32)
    scale = jnp.reshape(-1.0 / (2.0 * variance), (1,))

    kernel = functools.partial(_fused_kernel, ncls, inv_p, True)
    out = pl.pallas_call(
        kernel,
        grid=grid,
        in_specs=[patches_spec, _resident(w_conv), _resident(b_conv),
                  _resident(w_head), _resident(b_head),
                  _resident(centers_t), _resident(c2), _resident(onehot),
                  pl.BlockSpec(memory_space=pltpu.MemorySpace.SMEM)],
        out_specs=out_spec,
        out_shape=out_shape,
        scratch_shapes=scratch_shapes,
        compiler_params=compiler_params,
    )(patches, w_conv, b_conv, w_head, b_head, centers_t, c2, onehot, scale)
    # TODO(synk): if the repo's get_softmax_probs(return_scores=True) returns
    # normalized posteriors (or (probs, scores)), divide rows by their sum here.
    return out.reshape(N, ncls)


# ---------------------------------------------------------------------------
# Pure-JAX reference (same synthetic backbone) for correctness checking.
# ---------------------------------------------------------------------------
def _reference_forward(x_nchw, params, magnet_data=None):
    N, C, H, W = x_nchw.shape
    F = params["conv_w"].shape[0]
    CK = C * 9
    P = H * W
    patches = jax.lax.conv_general_dilated_patches(
        x_nchw, filter_shape=(3, 3), window_strides=(1, 1), padding="SAME")
    patches = jnp.transpose(patches, (0, 2, 3, 1)).reshape(N, P, CK).astype(jnp.bfloat16)
    w = params["conv_w"].reshape(F, CK).T.astype(jnp.bfloat16)
    y = jnp.einsum("npk,kf->npf", patches, w, preferred_element_type=jnp.float32)
    y = jnp.maximum(y + params["conv_b"].reshape(1, 1, F), 0.0)
    pooled = jnp.mean(y, axis=1)                                         # [N, F]
    logits = pooled @ params["w_logits"] + params["b_logits"]
    emb = pooled @ params["w_emb"] + params["b_emb"]
    if magnet_data is None:
        return logits
    centers = magnet_data["cluster_centers"].astype(jnp.float32)
    d2 = jnp.sum((emb[:, None, :] - centers[None, :, :]) ** 2, axis=-1)  # [N, J]
    var = jnp.asarray(magnet_data["variance"], dtype=jnp.float32)
    cluster_scores = jnp.exp(-d2 / (2.0 * var))
    onehot = jax.nn.one_hot(magnet_data["cluster_classes"],
                            int(magnet_data["L"]), dtype=jnp.float32)
    return cluster_scores @ onehot                                       # [N, ncls]


if __name__ == "__main__":
    key = jax.random.PRNGKey(0)
    k = jax.random.split(key, 6)

    N, C, H, W = 2, 4, 16, 16      # NCHW, like PyTorch
    F, D, NCLS, K = 32, 32, 10, 2  # conv filters, embedding dim, classes, clusters/class

    x = jax.random.normal(k[0], (N, C, H, W), dtype=jnp.float32)

    params = dict(
        conv_w=0.1 * jax.random.normal(k[1], (F, C, 3, 3), dtype=jnp.float32),
        conv_b=jnp.zeros((1, F), dtype=jnp.float32),
        w_logits=0.1 * jax.random.normal(k[2], (F, NCLS), dtype=jnp.float32),
        b_logits=jnp.zeros((1, NCLS), dtype=jnp.float32),
        w_emb=0.1 * jax.random.normal(k[3], (F, D), dtype=jnp.float32),
        b_emb=jnp.zeros((1, D), dtype=jnp.float32),
    )

    magnet_data = dict(
        cluster_centers=jax.random.normal(k[4], (NCLS * K, D), dtype=jnp.float32),
        cluster_classes=jnp.arange(NCLS * K, dtype=jnp.int32) // K,
        variance=jnp.float32(0.5),
        K=K,
        L=NCLS,
    )

    # magnet path (return_scores=True -> raw per-class scores); tile_rows=128
    # exercises the multi-tile GAP accumulation (2 row tiles per image).
    scores = model_for_robustbench_forward(x, params, magnet_data, tile_rows=128)
    scores = jax.block_until_ready(scores)
    assert scores.shape == (N, NCLS)
    assert bool(jnp.all(jnp.isfinite(scores)))
    assert bool(jnp.all(scores >= 0.0))

    ref_scores = _reference_forward(x, params, magnet_data)
    probs = scores / jnp.sum(scores, axis=1, keepdims=True)
    ref_probs = ref_scores / jnp.sum(ref_scores, axis=1, keepdims=True)
    assert bool(jnp.allclose(probs, ref_probs, atol=2e-3)), "magnet scores mismatch"

    # magnet_data=None branch (plain logits), auto tile size.
    logits = jax.block_until_ready(model_for_robustbench_forward(x, params, None))
    ref_logits = _reference_forward(x, params, None)
    assert logits.shape == (N, NCLS)
    assert bool(jnp.allclose(logits, ref_logits, atol=2e-2, rtol=2e-2)), "logits mismatch"

    print("KERNEL_OK")
</pallas_src>

<mosaic_0001>
module attributes {stable_mosaic.version = 11 : i64} {
  func.func @_fused_kernel(%arg0: i32, %arg1: i32, %arg2: memref<1x128x64xbf16, #tpu.memory_space<vmem>>, %arg3: memref<64x32xbf16, #tpu.memory_space<vmem>>, %arg4: memref<1x32xf32, #tpu.memory_space<vmem>>, %arg5: memref<32x42xf32, #tpu.memory_space<vmem>>, %arg6: memref<1x42xf32, #tpu.memory_space<vmem>>, %arg7: memref<32x20xf32, #tpu.memory_space<vmem>>, %arg8: memref<1x20xf32, #tpu.memory_space<vmem>>, %arg9: memref<20x10xf32, #tpu.memory_space<vmem>>, %arg10: memref<1xf32, #tpu.memory_space<smem>>, %arg11: memref<1x1x10xf32, #tpu.memory_space<vmem>>, %arg12: memref<1x32xf32, #tpu.memory_space<vmem>>) attributes {dimension_semantics = [#tpu.dimension_semantics<parallel>, #tpu.dimension_semantics<arbitrary>], iteration_bounds = array<i64: 2, 2>, scalar_prefetch = 0 : i64, scratch_operands = 1 : i64, tpu.core_type = #tpu.core_type<tc>, window_params = [{transform_indices = @transform_0, window_bounds = array<i64: 1, 128, 64>}, {pipeline_mode = #tpu.pipeline_mode<synchronous>, transform_indices = @transform_1, window_bounds = array<i64: 64, 32>}, {pipeline_mode = #tpu.pipeline_mode<synchronous>, transform_indices = @transform_2, window_bounds = array<i64: 1, 32>}, {pipeline_mode = #tpu.pipeline_mode<synchronous>, transform_indices = @transform_3, window_bounds = array<i64: 32, 42>}, {pipeline_mode = #tpu.pipeline_mode<synchronous>, transform_indices = @transform_4, window_bounds = array<i64: 1, 42>}, {pipeline_mode = #tpu.pipeline_mode<synchronous>, transform_indices = @transform_5, window_bounds = array<i64: 32, 20>}, {pipeline_mode = #tpu.pipeline_mode<synchronous>, transform_indices = @transform_6, window_bounds = array<i64: 1, 20>}, {pipeline_mode = #tpu.pipeline_mode<synchronous>, transform_indices = @transform_7, window_bounds = array<i64: 20, 10>}, {transform_indices = @transform_8, window_bounds = array<i64: 1>}, {transform_indices = @transform_9, window_bounds = array<i64: 1, 1, 10>}]} {
    %c0_i32 = arith.constant 0 : i32
    %0 = arith.cmpi eq, %arg1, %c0_i32 : i32
    %1 = arith.extui %0 : i1 to i32
    %c0_i32_0 = arith.constant 0 : i32
    %2 = arith.cmpi ne, %1, %c0_i32_0 : i32
    scf.if %2 {
      %cst_14 = arith.constant 0.000000e+00 : f32
      %20 = vector.broadcast %cst_14 : f32 to vector<1x32xf32>
      %c0_15 = arith.constant 0 : index
      %c0_16 = arith.constant 0 : index
      %21 = vector.load %arg12[%c0_15, %c0_16] : memref<1x32xf32, #tpu.memory_space<vmem>>, vector<1x32xf32>
      tpu.vector_store %arg12[%c0_15, %c0_16], %20 {strides = array<i32>} : memref<1x32xf32, #tpu.memory_space<vmem>>, vector<1x32xf32>,
    } else {
    }
    %c0 = arith.constant 0 : index
    %c0_1 = arith.constant 0 : index
    %c0_2 = arith.constant 0 : index
    %3 = vector.load %arg2[%c0, %c0_1, %c0_2] : memref<1x128x64xbf16, #tpu.memory_space<vmem>>, vector<1x128x64xbf16>
    %4 = vector.shape_cast %3 : vector<1x128x64xbf16> to vector<128x64xbf16>
    %c0_3 = arith.constant 0 : index
    %c0_4 = arith.constant 0 : index
    %5 = vector.load %arg3[%c0_3, %c0_4] : memref<64x32xbf16, #tpu.memory_space<vmem>>, vector<64x32xbf16>
    %cst = arith.constant dense<0.000000e+00> : vector<128x32xf32>
    %6 = tpu.matmul %4, %5, %cst {dimension_numbers = #tpu.dot_dimension_numbers<[1], [0], [0], [1], [0, 0, 1, 1], [], []>} : vector<128x64xbf16>, vector<64x32xbf16>, vector<128x32xf32> -> vector<128x32xf32>
    %c0_5 = arith.constant 0 : index
    %c0_6 = arith.constant 0 : index
    %7 = vector.load %arg4[%c0_5, %c0_6] : memref<1x32xf32, #tpu.memory_space<vmem>>, vector<1x32xf32>
    %8 = vector.broadcast %7 : vector<1x32xf32> to vector<128x32xf32>
    %9 = arith.addf %6, %8 : vector<128x32xf32>
    %cst_7 = arith.constant 0.000000e+00 : f32
    %10 = vector.broadcast %cst_7 : f32 to vector<128x32xf32>
    %11 = arith.maximumf %9, %10 : vector<128x32xf32>
    %c0_8 = arith.constant 0 : index
    %c0_9 = arith.constant 0 : index
    %12 = vector.load %arg12[%c0_8, %c0_9] : memref<1x32xf32, #tpu.memory_space<vmem>>, vector<1x32xf32>
    %cst_10 = arith.constant dense<0.000000e+00> : vector<32xf32>
    %13 = vector.multi_reduction <add>, %11, %cst_10 [0] : vector<128x32xf32> to vector<32xf32>
    %14 = vector.shape_cast %13 : vector<32xf32> to vector<1x32xf32>
    %15 = arith.addf %12, %14 : vector<1x32xf32>
    %c0_11 = arith.constant 0 : index
    %c0_12 = arith.constant 0 : index
    %16 = vector.load %arg12[%c0_11, %c0_12] : memref<1x32xf32, #tpu.memory_space<vmem>>, vector<1x32xf32>
    tpu.vector_store %arg12[%c0_11, %c0_12], %15 {strides = array<i32>} : memref<1x32xf32, #tpu.memory_space<vmem>>, vector<1x32xf32>,
    %c1_i32 = arith.constant 1 : i32
    %17 = arith.cmpi eq, %arg1, %c1_i32 : i32
    %18 = arith.extui %17 : i1 to i32
    %c0_i32_13 = arith.constant 0 : i32
    %19 = arith.cmpi ne, %18, %c0_i32_13 : i32
    scf.if %19 {
      %c0_14 = arith.constant 0 : index
      %c0_15 = arith.constant 0 : index
      %20 = vector.load %arg12[%c0_14, %c0_15] : memref<1x32xf32, #tpu.memory_space<vmem>>, vector<1x32xf32>
      %cst_16 = arith.constant 3.906250e-03 : f32
      %21 = vector.broadcast %cst_16 : f32 to vector<1x32xf32>
      %22 = arith.mulf %20, %21 : vector<1x32xf32>
      %c0_17 = arith.constant 0 : index
      %c0_18 = arith.constant 0 : index
      %23 = vector.load %arg5[%c0_17, %c0_18] : memref<32x42xf32, #tpu.memory_space<vmem>>, vector<32x42xf32>
      %cst_19 = arith.constant dense<0.000000e+00> : vector<1x42xf32>
      %24 = tpu.matmul %22, %23, %cst_19 {dimension_numbers = #tpu.dot_dimension_numbers<[1], [0], [0], [1], [0, 0, 1, 1], [], []>} : vector<1x32xf32>, vector<32x42xf32>, vector<1x42xf32> -> vector<1x42xf32>
      %c0_20 = arith.constant 0 : index
      %c0_21 = arith.constant 0 : index
      %25 = vector.load %arg6[%c0_20, %c0_21] : memref<1x42xf32, #tpu.memory_space<vmem>>, vector<1x42xf32>
      %26 = arith.addf %24, %25 : vector<1x42xf32>
      %27 = vector.extract_strided_slice %26 {offsets = [0, 10], sizes = [1, 32], strides = [1, 1]} : vector<1x42xf32> to vector<1x32xf32>
      %28 = arith.mulf %27, %27 : vector<1x32xf32>
      %cst_22 = arith.constant dense<0.000000e+00> : vector<1xf32>
      %29 = vector.multi_reduction <add>, %28, %cst_22 [1] : vector<1x32xf32> to vector<1xf32>
      %30 = vector.shape_cast %29 : vector<1xf32> to vector<1x1xf32>
      %c0_23 = arith.constant 0 : index
      %c0_24 = arith.constant 0 : index
      %31 = vector.load %arg7[%c0_23, %c0_24] : memref<32x20xf32, #tpu.memory_space<vmem>>, vector<32x20xf32>
      %cst_25 = arith.constant dense<0.000000e+00> : vector<1x20xf32>
      %32 = tpu.matmul %27, %31, %cst_25 {dimension_numbers = #tpu.dot_dimension_numbers<[1], [0], [0], [1], [0, 0, 1, 1], [], []>} : vector<1x32xf32>, vector<32x20xf32>, vector<1x20xf32> -> vector<1x20xf32>
      %c0_26 = arith.constant 0 : index
      %c0_27 = arith.constant 0 : index
      %33 = vector.load %arg8[%c0_26, %c0_27] : memref<1x20xf32, #tpu.memory_space<vmem>>, vector<1x20xf32>
      %34 = vector.broadcast %30 : vector<1x1xf32> to vector<1x20xf32>
      %35 = arith.addf %34, %33 : vector<1x20xf32>
      %cst_28 = arith.constant 2.000000e+00 : f32
      %36 = vector.broadcast %cst_28 : f32 to vector<1x20xf32>
      %37 = arith.mulf %36, %32 : vector<1x20xf32>
      %38 = arith.subf %35, %37 : vector<1x20xf32>
      %cst_29 = arith.constant 0.000000e+00 : f32
      %39 = vector.broadcast %cst_29 : f32 to vector<1x20xf32>
      %40 = arith.maximumf %38, %39 : vector<1x20xf32>
      %c0_30 = arith.constant 0 : index
      %41 = memref.load %arg10[%c0_30] : memref<1xf32, #tpu.memory_space<smem>>
      %42 = vector.broadcast %41 : f32 to vector<1x20xf32>
      %43 = arith.mulf %42, %40 : vector<1x20xf32>
      %44 = math.exp %43 : vector<1x20xf32>
      %c0_31 = arith.constant 0 : index
      %c0_32 = arith.constant 0 : index
      %45 = vector.load %arg9[%c0_31, %c0_32] : memref<20x10xf32, #tpu.memory_space<vmem>>, vector<20x10xf32>
      %cst_33 = arith.constant dense<0.000000e+00> : vector<1x10xf32>
      %46 = tpu.matmul %44, %45, %cst_33 {dimension_numbers = #tpu.dot_dimension_numbers<[1], [0], [0], [1], [0, 0, 1, 1], [], []>} : vector<1x20xf32>, vector<20x10xf32>, vector<1x10xf32> -> vector<1x10xf32>
      %c0_34 = arith.constant 0 : index
      %c0_35 = arith.constant 0 : index
      %c0_36 = arith.constant 0 : index
      %47 = vector.load %arg11[%c0_34, %c0_35, %c0_36] : memref<1x1x10xf32, #tpu.memory_space<vmem>>, vector<1x1x10xf32>
      %48 = vector.shape_cast %47 : vector<1x1x10xf32> to vector<1x10xf32>
      %49 = vector.shape_cast %46 : vector<1x10xf32> to vector<1x1x10xf32>
      tpu.vector_store %arg11[%c0_34, %c0_35, %c0_36], %49 {strides = array<i32>} : memref<1x1x10xf32, #tpu.memory_space<vmem>>, vector<1x1x10xf32>,
    } else {
    }
    return
  }
  func.func @transform_0(%arg0: i32, %arg1: i32) -> (i32, i32, i32) {
    %c0_i32 = arith.constant 0 : i32
    %c0_i32_0 = arith.constant 0 : i32
    return %arg0, %arg1, %c0_i32 : i32, i32, i32
  }
  func.func @transform_1(%arg0: i32, %arg1: i32) -> (i32, i32) {
    %c0_i32 = arith.constant 0 : i32
    %c0_i32_0 = arith.constant 0 : i32
    %c0_i32_1 = arith.constant 0 : i32
    return %c0_i32, %c0_i32_0 : i32, i32
  }
  func.func @transform_2(%arg0: i32, %arg1: i32) -> (i32, i32) {
    %c0_i32 = arith.constant 0 : i32
    %c0_i32_0 = arith.constant 0 : i32
    %c0_i32_1 = arith.constant 0 : i32
    return %c0_i32, %c0_i32_0 : i32, i32
  }
  func.func @transform_3(%arg0: i32, %arg1: i32) -> (i32, i32) {
    %c0_i32 = arith.constant 0 : i32
    %c0_i32_0 = arith.constant 0 : i32
    %c0_i32_1 = arith.constant 0 : i32
    return %c0_i32, %c0_i32_0 : i32, i32
  }
  func.func @transform_4(%arg0: i32, %arg1: i32) -> (i32, i32) {
    %c0_i32 = arith.constant 0 : i32
    %c0_i32_0 = arith.constant 0 : i32
    %c0_i32_1 = arith.constant 0 : i32
    return %c0_i32, %c0_i32_0 : i32, i32
  }
  func.func @transform_5(%arg0: i32, %arg1: i32) -> (i32, i32) {
    %c0_i32 = arith.constant 0 : i32
    %c0_i32_0 = arith.constant 0 : i32
    %c0_i32_1 = arith.constant 0 : i32
    return %c0_i32, %c0_i32_0 : i32, i32
  }
  func.func @transform_6(%arg0: i32, %arg1: i32) -> (i32, i32) {
    %c0_i32 = arith.constant 0 : i32
    %c0_i32_0 = arith.constant 0 : i32
    %c0_i32_1 = arith.constant 0 : i32
    return %c0_i32, %c0_i32_0 : i32, i32
  }
  func.func @transform_7(%arg0: i32, %arg1: i32) -> (i32, i32) {
    %c0_i32 = arith.constant 0 : i32
    %c0_i32_0 = arith.constant 0 : i32
    %c0_i32_1 = arith.constant 0 : i32
    return %c0_i32, %c0_i32_0 : i32, i32
  }
  func.func @transform_8(%arg0: i32, %arg1: i32) -> i32 {
    %c0_i32 = arith.constant 0 : i32
    %c0_i32_0 = arith.constant 0 : i32
    return %c0_i32 : i32
  }
  func.func @transform_9(%arg0: i32, %arg1: i32) -> (i32, i32, i32) {
    %c0_i32 = arith.constant 0 : i32
    %c0_i32_0 = arith.constant 0 : i32
    %c0_i32_1 = arith.constant 0 : i32
    return %arg0, %c0_i32, %c0_i32_0 : i32, i32, i32
  }
}

</mosaic_0001>

<bundles_post_ra>
// kernel: tpu_custom_call.1
= control target key start
LH: loop header
LB: loop body
LE: loop exit
PB: predicated region body
PF: predicated region fallthrough
CT: control target
= control target key end

     0   :  { %s1601_s0 = inlined_call_operand.vmem [shape: bf16[2,256,64], index: 0, kind: input, shape index: {}]   ;;  %s1602_s1 = inlined_call_operand.vmem [shape: bf16[64,32], index: 1, kind: input, shape index: {}]   ;;  %s1603_s2 = inlined_call_operand.vmem [shape: f32[1,32], index: 2, kind: input, shape index: {}]   ;;  %s1604_s3 = inlined_call_operand.vmem [shape: f32[32,42], index: 3, kind: input, shape index: {}]   ;;  %s1605_s4 = inlined_call_operand.vmem [shape: f32[1,42], index: 4, kind: input, shape index: {}]   ;;  %s1606_s5 = inlined_call_operand.vmem [shape: f32[32,20], index: 5, kind: input, shape index: {}]   ;;  %s1607_s6 = inlined_call_operand.vmem [shape: f32[1,20], index: 6, kind: input, shape index: {}]   ;;  %s1608_s7 = inlined_call_operand.vmem [shape: f32[20,10], index: 7, kind: input, shape index: {}]   ;;  %s1609_s8 = inlined_call_operand.<no memory space> [shape: f32[1], index: 8, kind: input, shape index: {}]   ;;  %s1610_s9 = inlined_call_operand.hbm [shape: f32[2,1,10], index: 9, kind: output, shape index: {}]  }
   0x1   :  { %14 = sst [smem:[#allocation3]] %s1609_s8 }
   0x2   :  { %15 = vsyncpa [#allocation5], 0 }
   0x3   :  { %17 = vsyncpa [#allocation5 + $0x1], 0  ;;  %s1358_s11 = smov 0   ;;  %s1360_s12 = smov 0  }
   0x4   :  { %s1362_s13 = smov 0   ;;  %s1364_s14 = smov 0  }
   0x5   :  { %s1366_s15 = smov 0   ;;  %s1368_s16 = smov 0  }
   0x6   :  { %s1370_s17 = smov 0   ;;  %s1372_s18 = smov 0  }
   0x7 LB: > { %1613 = sst [smem:[#allocation7_spill]] %s1294_s17  ;;  %s990_s8 = sadd.s32 4294967295, %s1298_s18   ;;  %s1298_s18 = sphi %s1372_s18, %s23_s18   ;;  %s1294_s17 = sphi %s1370_s17, %s1620_s17   ;;  %s1290_s16 = sphi %s1368_s16, %s1625_s16   ;;  %s1286_s15 = sphi %s1366_s15, %s1618_s15   ;;  %s1282_s14 = sphi %s1364_s14, %s1624_s14   ;;  %s1278_s13 = sphi %s1362_s13, %s1623_s13   ;;  %s1274_s12 = sphi %s1360_s12, %s1622_s12   ;;  %s1270_s11 = sphi %s1358_s11, %s1621_s11  }
   0x8   : > { %s991_s19 = sadd.s32 4294967294, %s1298_s18   ;;  %s32_s20 = sadd.s32 1, %s1290_s16 }
   0x9   : > { %p33_p0 = scmp.ge.s32.totalorder %s32_s20, 2  ;;  %s35_s21 = sadd.s32 1, %s1294_s17 }
   0xa   : > { %p248_p1 = scmp.ne.s32.totalorder %s1278_s13, %s1274_s12  ;;  %p249_p2 = scmp.eq.s32.totalorder %s990_s8, 3 }
   0xb   : > { %s1627_s20 = smov (%p33_p0, %s32_s20), 0  ;;  %s1629_s21 = smov (!%p33_p0, %s35_s21), %s1294_s17 }
   0xc   : > { %1614 = sst [smem:[#allocation8_spill]] %s1627_s20  ;;  %p1407_p3 = por %p249_p2, %p248_p1 }
   0xd   : > { %p254_p4 = scmp.ne.s32.totalorder %s1274_s12, %s1270_s11  ;;  %p37_p5 = scmp.ge.s32.totalorder %s1629_s21, 2 }
   0xe   : > { %p255_p6 = scmp.eq.s32.totalorder %s991_s19, 3  ;;  %p994_p7 = scmp.ge.s32.totalorder %s1298_s18, 1 }
   0xf   : > { %p310_p8 = scmp.lt.s32.totalorder %s1298_s18, 5  ;;  %s1631_s21 = smov (%p37_p5, %s1629_s21), 0 }
  0x10   : > { %1616 = sst [smem:[#allocation9_spill]] %s1631_s21  ;;  %p1417_p9 = por %p255_p6, %p254_p4 }
  0x11   : > { %p311_p10 = pnand %p994_p7, %p310_p8  ;;  %s235_s24 = ssub.s32 %s1294_s17, %s1631_s21 }
  0x12   : > { %s238_s25 = sadd.s32 1, %s1278_s13  ;;  %p236_p11 = scmp.eq.s32.totalorder %s235_s24, 0 }
  0x13   : > { %314 = sbr.rel (%p311_p10) target bundleno = 1052 (0x41c), region = 56  ;;  %s347_s27 = sand.u32 (!%p311_p10), 1, %s1274_s12  }
  0x14   : > { %s1425_s26 = scalar_select %p236_p11, %s1278_s13, %s238_s25  }
  0x15   : > { %s995_s28 = sshll.u32 (!%p311_p10), %s1282_s14, 4  ;;  %p350_p12 = scmp.lt.s32.totalorder (!%p311_p10), %s1286_s15, 1 }
  0x16   : > { %p352_p13 = scmp.lt.s32.totalorder (!%p311_p10), %s995_s28, 31  ;;  %s1438_s25 = scalar_lea.vmem (!%p311_p10), [#allocation4], %s347_s27 }
  0x17   : > { %p998_p0 = scmp.ne.s32.totalorder (!%p311_p10), %s1282_s14, 0 }
  0x18   : > { %s351_s29 = scalar_select %p350_p12, %s1286_s15, 1 }
  0x19   : > { %s1633_s28 = smov (!%p352_p13, %s995_s28), 31  ;;  %363 = sbr.rel (%p998_p0) target bundleno = 32 (0x20), region = 60 }
  0x1a   : > { %s996_s30 = sshll.u32 %s351_s29, 5 }
  0x1b   : > { %s355_s10 = sadd.s32 %s996_s30, %s1633_s28 }
  0x1c   : > { %s997_s8 = sshll.u32 %s355_s10, 2 }
  0x1d   : > { %s1434_s24 = scalar_lea.vmem %s1601_s0, %s997_s8 }
  0x1e   : > { %vm364_vm0 = vcmask 253952   ;;  %v1300_v0 = vmov 0.0  }
  0x1f   : > { %365 = vst.msk [vmem:[#allocation2] sm:$0x1] %vm364_vm0, %v1300_v0 }
  0x20 PF: > { %v1192_v1 = vld [vmem:[%s1602_s1 + $0x18] sm:$0xff]   ;;  %v1193_v2 = vld [vmem:[%s1602_s1 + $0x10] sm:$0xff]   ;;  %v1194_v3 = vld [vmem:[%s1602_s1 + $0x8] sm:$0xff]   ;;  %vm461_vm1 = vcmask 523264   ;;  %vm600_vm2 = vcmask 261120   ;;  %vm639_vm3 = vcmask 253952  }
  0x21   : > { %1054 = vmatprep.subr.bf16.mxu0 %v1192_v1  ;;  %1109 = vmatprep.subr.bf16.mxu1 %v1192_v1  ;;  %v1196_v4 = vld [vmem:[%s1434_s24] sm:$0xff]   ;;  %v1197_v7 = vld [vmem:[%s1434_s24 + $0x8] sm:$0xff]   ;;  %v1198_v9 = vld [vmem:[%s1434_s24 + $0x10] sm:$0xff]   ;;  %p1020_p1 = scmp.ne.s32.totalorder %s1282_s14, 1 }
  0x22   : > { %1055 = vmatpush3.bf16.msra.mxu0 %v1192_v1  ;;  %1113 = vmatpush3.bf16.msra.mxu1 %v1192_v1  ;;  %v1195_v5 = vld [vmem:[%s1602_s1] sm:$0xff]   ;;  %v1201_v8 = vld [vmem:[%s1434_s24 + $0x28] sm:$0xff]   ;;  %v1202_v10 = vld [vmem:[%s1434_s24 + $0x30] sm:$0xff]   ;;  %s1303_s17 = smov (!%p1020_p1), 118   ;;  %s817_s29 = sld [smem:[#allocation3]] (!%p1020_p1) }
  0x23   : > { %1056 = vmatprep.subr.bf16.mxu0 %v1193_v2  ;;  %1110 = vmatprep.subr.bf16.mxu1 %v1193_v2  ;;  %v1200_v6 = vld [vmem:[%s1434_s24 + $0x20] sm:$0xff]   ;;  %v1199_v11 = vld [vmem:[%s1434_s24 + $0x18] sm:$0xff]  }
  0x24   : > { %1062 = vmatprep.mubr.msk.bf16.mxu0 %vm461_vm1, %v1196_v4  ;;  %1070 = vmatprep.mubr.msk.bf16.mxu1 %vm461_vm1, %v1200_v6  ;;  %v1203_v12 = vld [vmem:[%s1434_s24 + $0x38] sm:$0xff]   ;;  %v1472_v15 = vld [vmem:[%s1603_s2] ss:$0 sm:$0xff] }
  0x26   : > { %1057 = vmatpush3.bf16.msra.mxu0 %v1193_v2  ;;  %1114 = vmatpush3.bf16.msra.mxu1 %v1193_v2 }
  0x27   : > { %1058 = vmatprep.subr.bf16.mxu0 %v1194_v3  ;;  %1111 = vmatprep.subr.bf16.mxu1 %v1194_v3 }
  0x2a   : > { %1059 = vmatpush3.bf16.msra.mxu0 %v1194_v3  ;;  %1115 = vmatpush3.bf16.msra.mxu1 %v1194_v3 }
  0x2b   : > { %1060 = vmatprep.subr.bf16.mxu0 %v1195_v5  ;;  %1112 = vmatprep.subr.bf16.mxu1 %v1195_v5 }
  0x2e   : > { %1061 = vmatpush3.bf16.msra.mxu0 %v1195_v5  ;;  %1116 = vmatpush3.bf16.msra.mxu1 %v1195_v5 }
  0x31   : > { %1063 = vmatmul.mubr.msk.bf16.vlgmr.msra.gmra.mxu0 %vm461_vm1, %v1197_v7  ;;  %1071 = vmatmul.mubr.msk.bf16.vlgmr.msra.gmra.mxu1 %vm461_vm1, %v1201_v8 }
  0x32   : > { %1066 = vmatprep.mubr.msk.bf16.mxu0 %vm461_vm1, %v1198_v9  ;;  %1074 = vmatprep.mubr.msk.bf16.mxu1 %vm461_vm1, %v1202_v10 }
  0x39   : > { %1067 = vmatmul.mubr.msk.bf16.gmra.mxu0 %vm461_vm1, %v1199_v11  ;;  %1075 = vmatmul.mubr.msk.bf16.gmra.mxu1 %vm461_vm1, %v1203_v12 }
  0xf1   : > { %v1064_v13 = vpop.f32.mrf.mxu0  ;;  %v1072_v14 = vpop.f32.mrf.mxu1 }
  0xf2   : > { %v529_v21 = vadd.f32 %v1064_v13, %v1472_v15  ;;  %v561_v59 = vadd.f32 %v1072_v14, %v1472_v15 }
  0xf3   : > { %v520_v16 = vpop.f32.mrf.mxu0  ;;  %v552_v17 = vpop.f32.mrf.mxu1 }
  0xf4   : > { %v521_v18 = vadd.f32 %v1472_v15, %v520_v16  ;;  %v585_v28 = vmax.f32 %v529_v21, 0.0  ;;  %v553_v50 = vadd.f32 %v1472_v15, %v552_v17  ;;  %v593_v3 = vmax.f32 %v561_v59, 0.0 }
  0xf5   : > { %v1065_v19 = vpop.f32.mrf.mxu0  ;;  %v1073_v20 = vpop.f32.mrf.mxu1 }
  0xf6   : > { %v583_v23 = vmax.f32 %v521_v18, 0.0  ;;  %v532_v24 = vadd.f32 %v1065_v19, %v1472_v15  ;;  %v604_v38 = vsel %vm600_vm2, %v585_v28, 0.0  ;;  %v591_v60 = vmax.f32 %v553_v50, 0.0 }
  0xf7   : > { %v523_v22 = vpop.f32.mrf.mxu0  ;;  %v555_v27 = vpop.f32.mrf.mxu1  ;;  %v564_v63 = vadd.f32 %v1073_v20, %v1472_v15  ;;  %v620_v11 = vsel %vm600_vm2, %v593_v3, 0.0 }
  0xf8   : > { %v524_v25 = vadd.f32 %v1472_v15, %v523_v22  ;;  %v601_v31 = vsel %vm600_vm2, %v583_v23, 0.0  ;;  %v586_v32 = vmax.f32 %v532_v24, 0.0  ;;  %v556_v55 = vadd.f32 %v1472_v15, %v555_v27 }
  0xf9   : > { %v1068_v26 = vpop.f32.mrf.mxu0  ;;  %v1076_v37 = vpop.f32.mrf.mxu1  ;;  %v616_v4 = vsel %vm600_vm2, %v591_v60, 0.0  ;;  %v594_v7 = vmax.f32 %v564_v63, 0.0 }
  0xfa   : > { %v584_v29 = vmax.f32 %v524_v25, 0.0  ;;  %v545_v39 = vadd.f32 %v1068_v26, %v1472_v15  ;;  %v606_v43 = vsel %vm600_vm2, %v586_v32, 0.0  ;;  %v592_v0 = vmax.f32 %v556_v55, 0.0 }
  0xfb   : > { %v536_v30 = vpop.f32.mrf.mxu0  ;;  %v568_v47 = vpop.f32.mrf.mxu1  ;;  %v577_v12 = vadd.f32 %v1076_v37, %v1472_v15  ;;  %v622_v16 = vsel %vm600_vm2, %v594_v7, 0.0 }
  0xfc   : > { %v602_v33 = vsel %vm600_vm2, %v584_v29, 0.0  ;;  %v537_v34 = vadd.f32 %v1472_v15, %v536_v30  ;;  %v589_v48 = vmax.f32 %v545_v39, 0.0  ;;  %v569_v5 = vadd.f32 %v1472_v15, %v568_v47 }
  0xfd   : > { %v603_v35 = vadd.f32 %v602_v33, %v601_v31  ;;  %v1069_v36 = vpop.f32.mrf.mxu0  ;;  %v1077_v57 = vpop.f32.mrf.mxu1  ;;  %v618_v8 = vsel %vm600_vm2, %v592_v0, 0.0  ;;  %v597_v20 = vmax.f32 %v577_v12, 0.0 }
  0xfe   : > { %v587_v40 = vmax.f32 %v537_v34, 0.0  ;;  %v548_v44 = vadd.f32 %v1069_v36, %v1472_v15  ;;  %v612_v58 = vsel %vm600_vm2, %v589_v48, 0.0  ;;  %v595_v13 = vmax.f32 %v569_v5, 0.0  ;;  %v599_v34 = vld [vmem:[#allocation2] sm:$0x1] }
  0xff   : > { %v605_v41 = vadd.f32 %v604_v38, %v603_v35  ;;  %v539_v42 = vpop.f32.mrf.mxu0  ;;  %v571_v2 = vpop.f32.mrf.mxu1  ;;  %v580_v17 = vadd.f32 %v1077_v57, %v1472_v15  ;;  %v628_v26 = vsel %vm600_vm2, %v597_v20, 0.0 }
 0x100   : > { %v540_v45 = vadd.f32 %v1472_v15, %v539_v42  ;;  %v608_v49 = vsel %vm600_vm2, %v587_v40, 0.0  ;;  %v590_v53 = vmax.f32 %v548_v44, 0.0  ;;  %v572_v9 = vadd.f32 %v1472_v15, %v571_v2 }
 0x101   : > { %v607_v46 = vadd.f32 %v606_v43, %v605_v41  ;;  %v624_v21 = vsel %vm600_vm2, %v595_v13, 0.0  ;;  %v598_v23 = vmax.f32 %v580_v17, 0.0 }
 0x102   : > { %v588_v51 = vmax.f32 %v540_v45, 0.0  ;;  %v614_v62 = vsel %vm600_vm2, %v590_v53, 0.0  ;;  %v596_v18 = vmax.f32 %v572_v9, 0.0 }
 0x103   : > { %v609_v52 = vadd.f32 %v608_v49, %v607_v46  ;;  %v630_v28 = vsel %vm600_vm2, %v598_v23, 0.0 }
 0x104   : > { %v610_v54 = vsel %vm600_vm2, %v588_v51, 0.0  ;;  %v626_v24 = vsel %vm600_vm2, %v596_v18, 0.0 }
 0x105   : > { %v611_v56 = vadd.f32 %v610_v54, %v609_v52 }
 0x107   : > { %v613_v61 = vadd.f32 %v612_v58, %v611_v56 }
 0x109   : > { %v615_v1 = vadd.f32 %v614_v62, %v613_v61 }
 0x10b   : > { %v617_v6 = vadd.f32 %v616_v4, %v615_v1 }
 0x10d   : > { %v619_v10 = vadd.f32 %v618_v8, %v617_v6 }
 0x10f   : > { %v621_v14 = vadd.f32 %v620_v11, %v619_v10 }
 0x111   : > { %v623_v19 = vadd.f32 %v622_v16, %v621_v14 }
 0x113   : > { %v625_v22 = vadd.f32 %v624_v21, %v623_v19 }
 0x115   : > { %v627_v25 = vadd.f32 %v626_v24, %v625_v22 }
 0x117   : > { %v629_v27 = vadd.f32 %v628_v26, %v627_v25 }
 0x119   : > { %v631_v29 = vadd.f32 %v630_v28, %v629_v27 }
 0x11b   : > { %v632_v30 = vrot.slane %v631_v29, 4 }
 0x11d   : > { %v633_v31 = vadd.f32 %v632_v30, %v631_v29 }
 0x11f   : > { %v634_v32 = vrot.slane %v633_v31, 2 }
 0x121   : > { %v635_v15 = vadd.f32 %v634_v32, %v633_v31 }
 0x123   : > { %v636_v33 = vrot.slane %v635_v15, 1 }
 0x125   : > { %v637_v35 = vadd.f32 %v636_v33, %v635_v15  ;;  %644 = sbr.rel (%p1020_p1) target bundleno = 1029 (0x405), region = 64 }
 0x127   : > { %v638_v36 = vadd.f32 %v637_v35, %v599_v34 }
 0x129   : > { %640 = vst.msk [vmem:[#allocation2] sm:$0x1] %vm639_vm3, %v638_v36 }
 0x12a   : > { %v650_v37 = vld [vmem:[%s1604_s3 + $0x18] sm:$0xff]  ;;  %v1301_v38 = vmov 0.0   ;;  %v649_v39 = vld [vmem:[%s1604_s3 + $0x10] sm:$0xff]  ;;  %vm1302_vm4 = vmmov 0   ;;  %v648_v41 = vld [vmem:[%s1604_s3 + $0x8] sm:$0xff]  ;;  %vm829_vm5 = vcmask 1043456   ;;  %v818_v2 = vstv %s817_s29 }
 0x12b   : > { %1078 = vmatprep.subr.mxu0 %v1301_v38  ;;  %1086 = vmatprep.mubr.msk.f32.mxu0 %vm1302_vm4, %v1301_v38  ;;  %v647_v42 = vld [vmem:[%s1604_s3] sm:$0xff]  ;;  %v736_v44 = vld [vmem:[%s1606_s5 + $0x18] sm:$0xff]  ;;  %v735_v45 = vld [vmem:[%s1606_s5 + $0x10] sm:$0xff]  ;;  %vm825_vm6 = vcmask 162816   ;;  %vm903_vm7 = vcmask 73728  }
 0x12c   : > { %1079 = vmatpush3.msra.mxu0 %v650_v37  ;;  %1089 = vmatprep.subr.mxu1 %v1301_v38  ;;  %v734_v46 = vld [vmem:[%s1606_s5 + $0x8] sm:$0xff]  ;;  %v733_v47 = vld [vmem:[%s1606_s5] sm:$0xff]  ;;  %v824_v56 = vld [vmem:[%s1608_s7 + $0x10] sm:$0xf] }
 0x12d   : > { %1080 = vmatprep.subr.mxu0 %v1301_v38  ;;  %1097 = vmatprep.mubr.msk.f32.mxu1 %vm1302_vm4, %v1301_v38  ;;  %v651_v48 = vld [vmem:[%s1605_s4] sm:$0x1]  ;;  %v823_v57 = vld [vmem:[%s1608_s7 + $0x8] sm:$0xff] }
 0x12e   : > { %1081 = vmatpush3.msra.mxu0 %v649_v39  ;;  %1090 = vmatpush3.msra.mxu1 %v736_v44  ;;  %v822_v58 = vld [vmem:[%s1608_s7] sm:$0xff] }
 0x12f   : > { %1082 = vmatprep.subr.mxu0 %v1301_v38  ;;  %1091 = vmatprep.subr.mxu1 %v1301_v38  ;;  %v812_v59 = vld [vmem:[%s1607_s6] sm:$0x1] }
 0x130   : > { %v645_v40 = vld [vmem:[#allocation2] sm:$0x1]  ;;  %1083 = vmatpush3.msra.mxu0 %v648_v41  ;;  %1092 = vmatpush3.msra.mxu1 %v735_v45 }
 0x131   : > { %v646_v43 = vmul.f32 0.00390625, %v645_v40  ;;  %1084 = vmatprep.subr.mxu0 %v1301_v38  ;;  %1093 = vmatprep.subr.mxu1 %v1301_v38 }
 0x132   : > { %1085 = vmatpush3.msra.mxu0 %v647_v42  ;;  %1094 = vmatpush3.msra.mxu1 %v734_v46 }
 0x133   : > { %1087 = vmatmul.mubr.msk.f32.vlgmr.msra.gmra.mxu0 %vm600_vm2, %v646_v43  ;;  %1100 = vmatprep.subr.mxu0 %v1301_v38 }
 0x134   : > { %1106 = vmatprep.mubr.msk.f32.mxu0 %vm1302_vm4, %v1301_v38  ;;  %1095 = vmatprep.subr.mxu1 %v1301_v38 }
 0x135   : > { %1096 = vmatpush3.msra.mxu1 %v733_v47  ;;  %1101 = vmatpush3.msk.msra.mxu0 %vm829_vm5, %v824_v56 }
 0x136   : > { %1102 = vmatprep.subr.mxu0 %v1301_v38 }
 0x137   : > { %1103 = vmatpush3.msra.mxu0 %v823_v57 }
 0x138   : > { %1104 = vmatprep.subr.mxu0 %v1301_v38 }
 0x139   : > { %1105 = vmatpush3.msra.mxu0 %v822_v58 }
 0x1f3   : > { %v721_v49 = vpop.f32.mrf.mxu0 }
 0x1f4   : > { %v722_v50 = vadd.f32 %v721_v49, %v651_v48 }
 0x1f5   : > { %v1088_v51 = vpop.f32.mrf.mxu0 }
 0x1f6   : > { %738 = vrot.lane.b32.xlu0 %v722_v50, %s1303_s17  ;;  %v725_v52 = vmul.f32 %v722_v50, %v722_v50 }
 0x1fa   : > { %727 = vrot.lane.b32.xlu0 %v725_v52, %s1303_s17 }
 0x268   : > { %v739_v53 = vpop.permute.xlu0 %738 }
 0x269   : > { %1098 = vmatmul.mubr.msk.f32.vlgmr.msra.gmra.mxu1 %vm600_vm2, %v739_v53 }
 0x26c   : > { %v728_v54 = vpop.permute.xlu0 %727 }
 0x26d   : > { %v730_v55 = vsel %vm639_vm3, %v728_v54, 0.0 }
 0x26e   : > { %731 = vadd.xlane.f32.xlu1 %v730_v55 }
 0x2f7   : > { %v732_v60 = vpop.xlane.xlu1 %731 }
 0x2f8   : > { %v813_v62 = vadd.f32 %v812_v59, %v732_v60 }
 0x329   : > { %v808_v61 = vpop.f32.mrf.mxu1 }
 0x32a   : > { %v814_v63 = vmul.f32 2.0, %v808_v61 }
 0x32b   : > { %v1099_v0 = vpop.f32.mrf.mxu1 }
 0x32c   : > { %v815_v1 = vsub.f32 %v813_v62, %v814_v63 }
 0x32e   : > { %v816_v3 = vmax.f32 %v815_v1, 0.0 }
 0x330   : > { %v819_v4 = vmul.f32 %v818_v2, %v816_v3 }
 0x332   : > { %v820_v5 = vmul.f32 1.442695, %v819_v4 }
 0x334   : > { %1204 = vpow2.f32 %v820_v5 }
 0x341   : > { %v1205_v6 = vpop.eup %1204 }
 0x342   : > { %1107 = vmatmul.mubr.msk.f32.vlgmr.msra.gmra.mxu0 %vm825_vm6, %v1205_v6 }
 0x402   : > { %v899_v7 = vpop.f32.mrf.mxu0 }
 0x403   : > { %904 = vst.msk [vmem:[%s1438_s25] sm:$0x1] %vm903_vm7, %v899_v7 }
 0x404   : > { %v1108_v8 = vpop.f32.mrf.mxu0 }
 0x405 PF: > { %s1025_s30 = sshll.u32 %s1286_s15, 4  ;;  %s918_s8 = sshll.u32 %s1438_s25, 4  ;;  %s919_s8 = int_to_ptr.vmem [resolvable:$true] %s918_s8 }
 0x406   : > { %s916_s10 = scalar_lea.hbm %s1610_s9, %s1025_s30  ;;  %s906_s19 = scalar_lea.sflag [#allocation5], %s347_s27 }
 0x407   : > { %s1206_s24 = scalar_lea.vmem %s919_s8, 16  ;;  %s1304_s28 = smov [#allocation4]  }
 0x408   : > { %p1207_p2 = scmp.ne.s32.totalorder %s919_s8, %s1206_s24  ;;  %s1210_s29 = sshll.u32 %s1304_s28, 4  ;;  %s1211_s29 = int_to_ptr.vmem [resolvable:$false] %s1210_s29 }
 0x409   : > { %s1212_s21 = scalar_lea.vmem %s1211_s29, 32  ;;  %p1213_p6 = scmp.lt.s32.totalorder %s919_s8, %s1211_s29 }
 0x40a   : > { %p1208_p4 = pnand %p1207_p2, %p1407_p3  ;;  %p1214_p7 = scmp.lt.s32.totalorder %s1212_s21, %s1206_s24 }
 0x40c   : > { %p1209_p5 = pneg %p1208_p4  ;;  %p1215_p8 = por %p1214_p7, %p1213_p6 }
 0x40e   : > { %p1216_p10 = pnand %p1215_p8, %p1209_p5 }
 0x410   : > { %1219 = shalt.err (!%p1216_p10)
}
 0x411   : > { %s1220_s15 = scalar_lea.hbm %s916_s10, 16  ;;  %s1224_s14 = scalar_lea.hbm %s1610_s9, 32 }
 0x412   : > { %p1221_p11 = scmp.ne.s32.totalorder %s916_s10, %s1220_s15  ;;  %p1225_p0 = scmp.lt.s32.totalorder %s916_s10, %s1610_s9 }
 0x413   : > { %p1226_p1 = scmp.lt.s32.totalorder %s1224_s14, %s1220_s15 }
 0x414   : > { %p1222_p12 = pnand %p1221_p11, %p1407_p3 }
 0x415   : > { %p1227_p2 = por %p1226_p1, %p1225_p0 }
 0x416   : > { %p1223_p13 = pneg %p1222_p12 }
 0x418   : > { %p1228_p4 = pnand %p1227_p2, %p1223_p13 }
 0x41a   : > { %1231 = shalt.err (!%p1228_p4)
}
 0x41b   : > { %1117 = dma.vmem_to_hbm [thread:$0]  (%p1407_p3), %s919_s8, 16, %s916_s10, %s906_s19  }
 0x41c PF: > { %p1123_p5 = scmp.ge.s32.totalorder %s1298_s18, 2  ;;  %s930_s20 = sand.u32 1, %s1270_s11  }
 0x41d   : > { %s931_s24 = scalar_lea.sflag [#allocation5], %s930_s20 }
 0x41e   : > { %p1120_p6 = pnand %p1123_p5, %p1417_p9 }
 0x420   : > { %p1121_p7 = pneg %p1120_p6 }
 0x422   : > { %1265 = dma.done.wait (%p1121_p7), %s931_s24, 16  }
 0x423   : > { %1267 = vsyncadd (%p1121_p7), %s931_s24, 4294967280  ;;  %s23_s18 = sadd.s32 1, %s1298_s18   ;;  %s1618_s15 = sld [smem:[#allocation7_spill]] }
 0x424   : > { %p20_p8 = scmp.ge.s32.totalorder %s23_s18, 6   ;;  %s1619_s22 = sld [smem:[#allocation8_spill]] }
 0x425   : > { %s1620_s17 = sld [smem:[#allocation9_spill]]  ;;  %s1621_s11 = smov %s1274_s12 }
 0x426   : > { %s1622_s12 = smov %s1278_s13  ;;  %s1623_s13 = smov %s1425_s26 }
 0x427   : > { %s1624_s14 = smov %s1290_s16  ;;  %22 = sbr.rel (!%p20_p8) target bundleno = 7 (0x7), region = 99 }
 0x42a   : > { %s1625_s16 = smov %s1619_s22 }
 0x42c   :  { %935 = vsyncpa [#allocation5], 1 }
 0x42d   :  { %937 = vsyncpa [#allocation5 + $0x1], 1 }

</bundles_post_ra>
